<compile_context>
chip_gen: v6e
topology: v6e:2x2x1
jax: 0.10.0
libtpu: 0.0.40
codegen_flags: <defaults>
</compile_context>

<pallas_src>
import functools

import jax
import jax.numpy as jnp
from jax.experimental import pallas as pl
from jax.experimental.pallas import tpu as pltpu


def _round_up(x, m):
    return ((x + m - 1) // m) * m


def _softplus(h):
    # torch.nn.Softplus(beta=1, threshold=20): linear branch above 20.
    # exp(h) only overflows f32 far above 20 and `where` already selects the
    # linear branch there, so no clamp is needed (removes a (bb, H) VALU temp).
    return jnp.where(h > 20.0, h, jnp.log1p(jnp.exp(h)))


def _layer2(h, b1_ref, w2_ref, b2_ref, out_ref, activation_dtype):
    h = h + b1_ref[...]                                # (bb, H) f32
    h = _softplus(h.astype(activation_dtype))          # optional bf16 EUP path
    # (bb, H) @ (H, 1): natural MXU shape -- no relayout of h.  The previous
    # lane-dense (1, bb) output form risked an XLU transpose of h (256 B/row)
    # to save only ~4 B/row of masked stores.
    q = jnp.dot(h, w2_ref[...], preferred_element_type=jnp.float32)
    out_ref[...] = (q + b2_ref[0]).astype(out_ref.dtype)


def _kernel_act(emb_ref, act_ref, w1e_ref, w1a_ref, b1_ref, w2_ref, b2_ref,
                out_ref, *, activation_dtype):
    # Layer 1 split into emb/act matmuls (no concatenated copy in HBM);
    # MXU accumulates in f32 regardless of the input dtype.
    h = jnp.dot(emb_ref[...], w1e_ref[...], preferred_element_type=jnp.float32)
    h = h + jnp.dot(act_ref[...], w1a_ref[...],
                    preferred_element_type=jnp.float32)
    _layer2(h, b1_ref, w2_ref, b2_ref, out_ref, activation_dtype)


def _kernel_noact(emb_ref, w1e_ref, b1_ref, w2_ref, b2_ref, out_ref, *,
                  activation_dtype):
    # action is None -> the zero (B, A) block contributes nothing; skip it.
    h = jnp.dot(emb_ref[...], w1e_ref[...], preferred_element_type=jnp.float32)
    _layer2(h, b1_ref, w2_ref, b2_ref, out_ref, activation_dtype)


def _sublane_multiple(*dtypes):
    # Block sublane granularity: 8 for 4-byte dtypes, 16 for 2-byte, 32 for 1.
    m = 8
    for dt in dtypes:
        m = max(m, 32 // max(1, jnp.dtype(dt).itemsize))
    return m


def td_critic_forward(embedding, action, params, *, block_b=8192,
                      activation_dtype=jnp.float32):
    """Forward pass of TemporalDifferenceCritic.

    embedding: (B, E) float (f32 or bf16 -- kept in its HBM dtype)
    action:    (B, A) float or None (None == zero action; matmul skipped)
    params:    dict with w1 (E+A, 64) pre-transposed as (in, out), b1 (64,),
               w2 (64, 1), b2 (1,)   -- f32
    activation_dtype: dtype for the softplus transcendentals (bf16 on v6e/v7x
               roughly doubles the binding EUP slot's throughput; default f32
               for parity with the torch reference).
    returns:   quality (B, 1) float32
    """
    B, E = embedding.shape
    H = params["b1"].shape[0]
    A = params["w1"].shape[0] - E
    has_action = (action is not None) and (A > 0)
    if has_action and tuple(action.shape) != (B, A):
        raise ValueError(f"action must have shape {(B, A)}, got {action.shape}")
    if has_action and not jnp.issubdtype(action.dtype, jnp.floating):
        action = action.astype(jnp.float32)       # torch does action.float()

    # Layer-1 weights split (emb | act) and cast to the activation's dtype so
    # bf16 producers get the native bf16 MXU path (f32 accumulate).  Weights
    # are tiny; no wrapper pass touches the (B, *) activations.
    w1 = params["w1"]
    w1e = w1[:E].astype(embedding.dtype)
    b1 = params["b1"].astype(jnp.float32).reshape(1, H)
    w2 = params["w2"].astype(activation_dtype).reshape(H, 1)
    b2 = params["b2"].astype(jnp.float32).reshape(1)

    # ---- block size -------------------------------------------------------
    sub = _sublane_multiple(embedding.dtype,
                            action.dtype if has_action else jnp.float32)
    bb = max(sub, min(int(block_b), 8192))   # 8192 cap keeps the lane-padded
                                             # per-step VMEM (+ temps) < ~48 MiB
                                             # -> safe on v7x's 64 MiB VMEM
    bb = min(bb, _round_up(B, sub))          # never bigger than one batch
    if B >= 1024:                            # >=2 grid steps so v7x's 2 TCs
        bb = min(bb, max(512, _round_up(-(-B // 2), 128)))     # both get work
    bb = _round_up(bb, sub)
    grid = (pl.cdiv(B, bb),)                 # no wrapper pad: the boundary
                                             # block is partial; row-local math
                                             # => garbage rows only reach
                                             # masked output rows

    # VMEM budget: minor dims (E, A, H, 1) all lane-pad to 128; input/output
    # blocks are double-buffered and Mosaic materialises a few (bb, H) temps.
    n_io = (2 if has_action else 1) + 1
    vmem_est = bb * 128 * 4 * (2 * n_io + 6)
    vmem_limit = int(min(max(vmem_est, 32 << 20), 56 << 20))

    def row_spec(cols):
        return pl.BlockSpec((bb, cols), lambda i: (i, 0))

    def const_spec(shape):
        return pl.BlockSpec(shape, lambda i: (0,) * len(shape))

    smem_spec = pl.BlockSpec(memory_space=pltpu.MemorySpace.SMEM)
    out_spec = pl.BlockSpec((bb, 1), lambda i: (i, 0))

    if has_action:
        w1a = w1[E:].astype(action.dtype)
        kernel = functools.partial(_kernel_act,
                                   activation_dtype=activation_dtype)
        in_specs = [row_spec(E), row_spec(A), const_spec((E, H)),
                    const_spec((A, H)), const_spec((1, H)),
                    const_spec((H, 1)), smem_spec]
        args = (embedding, action, w1e, w1a, b1, w2, b2)
        in_bytes = (embedding.size * embedding.dtype.itemsize
                    + action.size * action.dtype.itemsize)
        flops = 2 * B * (E + A) * H + 2 * B * H
    else:
        kernel = functools.partial(_kernel_noact,
                                   activation_dtype=activation_dtype)
        in_specs = [row_spec(E), const_spec((E, H)), const_spec((1, H)),
                    const_spec((H, 1)), smem_spec]
        args = (embedding, w1e, b1, w2, b2)
        in_bytes = embedding.size * embedding.dtype.itemsize
        flops = 2 * B * E * H + 2 * B * H

    cost = pl.CostEstimate(
        flops=flops,
        transcendentals=2 * B * H,               # exp + log1p per hidden unit
        bytes_accessed=in_bytes + B * 4 + (E + A) * H * 4 + 2 * H * 4 + 4)

    # TODO(synk): if a trace shows exposed DMA at the chosen block size, add
    # pipeline_mode=pl.Buffered(3) to the emb/act row specs.
    out = pl.pallas_call(
        kernel,
        out_shape=jax.ShapeDtypeStruct((B, 1), jnp.float32),
        grid=grid,
        in_specs=in_specs,
        out_specs=out_spec,
        cost_estimate=cost,
        compiler_params=pltpu.CompilerParams(
            dimension_semantics=("parallel",),
            vmem_limit_bytes=vmem_limit),
    )(*args)

    return out


def init_params(key, embedding_dim=16, action_dim=4, hidden=64):
    """Deterministic synthetic init matching nn.Linear shapes (pre-transposed)."""
    k1, k2, k3, k4 = jax.random.split(key, 4)
    in_dim = embedding_dim + action_dim
    lim1 = 1.0 / jnp.sqrt(in_dim)
    lim2 = 1.0 / jnp.sqrt(hidden)
    return {
        "w1": jax.random.uniform(k1, (in_dim, hidden), jnp.float32, -lim1, lim1),
        "b1": jax.random.uniform(k2, (hidden,), jnp.float32, -lim1, lim1),
        "w2": jax.random.uniform(k3, (hidden, 1), jnp.float32, -lim2, lim2),
        "b2": jax.random.uniform(k4, (1,), jnp.float32, -lim2, lim2),
    }


def _reference(embedding, action, params):
    # Pure-JAX reference (zero action == dropping the action columns of w1).
    emb = embedding.astype(jnp.float32)
    if action is None:
        x = emb
        w1 = params["w1"][: embedding.shape[1]]
    else:
        x = jnp.concatenate([emb, action.astype(jnp.float32)], axis=-1)
        w1 = params["w1"]
    h = x @ w1 + params["b1"]
    h = jnp.where(h > 20.0, h, jnp.log1p(jnp.exp(h)))
    return h @ params["w2"] + params["b2"].reshape(1, 1)


# TODO(synk): nn.Embedding(9, 1) `self.e`, MSELoss and update()/fit() are
# training-side / unused in forward(); only the forward pass is implemented.

if __name__ == "__main__":
    key = jax.random.PRNGKey(0)
    kp, ke, ka, ke2, ka2 = jax.random.split(key, 5)

    E, A = 16, 4
    params = init_params(kp, embedding_dim=E, action_dim=A)

    # --- small exact-block case, with action --------------------------------
    B = 8
    embedding = jax.random.normal(ke, (B, E), dtype=jnp.float32)
    action = jax.random.normal(ka, (B, A), dtype=jnp.float32)
    quality = jax.block_until_ready(td_critic_forward(embedding, action, params))
    assert quality.shape == (B, 1)
    assert jnp.allclose(quality, _reference(embedding, action, params),
                        atol=1e-5, rtol=1e-5)

    # --- action=None path (no zero array materialised, matmul skipped) ------
    q_none = jax.block_until_ready(td_critic_forward(embedding, None, params))
    assert q_none.shape == (B, 1)
    assert jnp.allclose(q_none, _reference(embedding, None, params),
                        atol=1e-5, rtol=1e-5)

    # --- non-divisible batch: no wrapper pad, partial boundary block --------
    B2 = 13
    emb2 = jax.random.normal(ke2, (B2, E), dtype=jnp.float32)
    act2 = jax.random.normal(ka2, (B2, A), dtype=jnp.float32)
    q2 = jax.block_until_ready(td_critic_forward(emb2, act2, params))
    assert q2.shape == (B2, 1)
    assert jnp.allclose(q2, _reference(emb2, act2, params), atol=1e-5, rtol=1e-5)

    # --- bf16-in-HBM inputs + bf16 softplus (v6e/v7x fast path) -------------
    # This intentionally changes numerics vs. the f32 torch reference, so it
    # is only sanity-checked (shape / finiteness).
    B3 = 16
    emb3 = jax.random.normal(ke2, (B3, E), dtype=jnp.float32).astype(jnp.bfloat16)
    act3 = jax.random.normal(ka2, (B3, A), dtype=jnp.float32).astype(jnp.bfloat16)
    q3 = jax.block_until_ready(
        td_critic_forward(emb3, act3, params, activation_dtype=jnp.bfloat16))
    assert q3.shape == (B3, 1) and bool(jnp.all(jnp.isfinite(q3)))

    print("KERNEL_OK")
</pallas_src>

<mosaic_0001>
module attributes {stable_mosaic.version = 11 : i64} {
  func.func @_kernel_act(%arg0: i32, %arg1: memref<8x16xf32, #tpu.memory_space<vmem>>, %arg2: memref<8x4xf32, #tpu.memory_space<vmem>>, %arg3: memref<16x64xf32, #tpu.memory_space<vmem>>, %arg4: memref<4x64xf32, #tpu.memory_space<vmem>>, %arg5: memref<1x64xf32, #tpu.memory_space<vmem>>, %arg6: memref<64x1xf32, #tpu.memory_space<vmem>>, %arg7: memref<1xf32, #tpu.memory_space<smem>>, %arg8: memref<8x1xf32, #tpu.memory_space<vmem>>) attributes {dimension_semantics = [#tpu.dimension_semantics<parallel>], iteration_bounds = array<i64: 1>, scalar_prefetch = 0 : i64, scratch_operands = 0 : i64, tpu.core_type = #tpu.core_type<tc>, window_params = [{transform_indices = @transform_0, window_bounds = array<i64: 8, 16>}, {transform_indices = @transform_1, window_bounds = array<i64: 8, 4>}, {pipeline_mode = #tpu.pipeline_mode<synchronous>, transform_indices = @transform_2, window_bounds = array<i64: 16, 64>}, {pipeline_mode = #tpu.pipeline_mode<synchronous>, transform_indices = @transform_3, window_bounds = array<i64: 4, 64>}, {pipeline_mode = #tpu.pipeline_mode<synchronous>, transform_indices = @transform_4, window_bounds = array<i64: 1, 64>}, {pipeline_mode = #tpu.pipeline_mode<synchronous>, transform_indices = @transform_5, window_bounds = array<i64: 64, 1>}, {transform_indices = @transform_6, window_bounds = array<i64: 1>}, {transform_indices = @transform_7, window_bounds = array<i64: 8, 1>}]} {
    %c0 = arith.constant 0 : index
    %c0_0 = arith.constant 0 : index
    %0 = vector.load %arg1[%c0, %c0_0] : memref<8x16xf32, #tpu.memory_space<vmem>>, vector<8x16xf32>
    %c0_1 = arith.constant 0 : index
    %c0_2 = arith.constant 0 : index
    %1 = vector.load %arg3[%c0_1, %c0_2] : memref<16x64xf32, #tpu.memory_space<vmem>>, vector<16x64xf32>
    %cst = arith.constant dense<0.000000e+00> : vector<8x64xf32>
    %2 = tpu.matmul %0, %1, %cst {dimension_numbers = #tpu.dot_dimension_numbers<[1], [0], [0], [1], [0, 0, 1, 1], [], []>} : vector<8x16xf32>, vector<16x64xf32>, vector<8x64xf32> -> vector<8x64xf32>
    %c0_3 = arith.constant 0 : index
    %c0_4 = arith.constant 0 : index
    %3 = vector.load %arg2[%c0_3, %c0_4] : memref<8x4xf32, #tpu.memory_space<vmem>>, vector<8x4xf32>
    %c0_5 = arith.constant 0 : index
    %c0_6 = arith.constant 0 : index
    %4 = vector.load %arg4[%c0_5, %c0_6] : memref<4x64xf32, #tpu.memory_space<vmem>>, vector<4x64xf32>
    %cst_7 = arith.constant dense<0.000000e+00> : vector<8x64xf32>
    %5 = tpu.matmul %3, %4, %cst_7 {dimension_numbers = #tpu.dot_dimension_numbers<[1], [0], [0], [1], [0, 0, 1, 1], [], []>} : vector<8x4xf32>, vector<4x64xf32>, vector<8x64xf32> -> vector<8x64xf32>
    %6 = arith.addf %2, %5 : vector<8x64xf32>
    %c0_8 = arith.constant 0 : index
    %c0_9 = arith.constant 0 : index
    %7 = vector.load %arg5[%c0_8, %c0_9] : memref<1x64xf32, #tpu.memory_space<vmem>>, vector<1x64xf32>
    %8 = vector.broadcast %7 : vector<1x64xf32> to vector<8x64xf32>
    %9 = arith.addf %6, %8 : vector<8x64xf32>
    %cst_10 = arith.constant 2.000000e+01 : f32
    %10 = vector.broadcast %cst_10 : f32 to vector<8x64xf32>
    %11 = arith.cmpf ogt, %9, %10 : vector<8x64xf32>
    %12 = math.exp %9 : vector<8x64xf32>
    %13 = math.log1p %12 : vector<8x64xf32>
    %14 = arith.select %11, %9, %13 : vector<8x64xi1>, vector<8x64xf32>
    %c0_11 = arith.constant 0 : index
    %c0_12 = arith.constant 0 : index
    %15 = vector.load %arg6[%c0_11, %c0_12] : memref<64x1xf32, #tpu.memory_space<vmem>>, vector<64x1xf32>
    %cst_13 = arith.constant dense<0.000000e+00> : vector<8x1xf32>
    %16 = tpu.matmul %14, %15, %cst_13 {dimension_numbers = #tpu.dot_dimension_numbers<[1], [0], [0], [1], [0, 0, 1, 1], [], []>} : vector<8x64xf32>, vector<64x1xf32>, vector<8x1xf32> -> vector<8x1xf32>
    %c0_14 = arith.constant 0 : index
    %17 = memref.load %arg7[%c0_14] : memref<1xf32, #tpu.memory_space<smem>>
    %18 = vector.broadcast %17 : f32 to vector<8x1xf32>
    %19 = arith.addf %16, %18 : vector<8x1xf32>
    %c0_15 = arith.constant 0 : index
    %c0_16 = arith.constant 0 : index
    %20 = vector.load %arg8[%c0_15, %c0_16] : memref<8x1xf32, #tpu.memory_space<vmem>>, vector<8x1xf32>
    tpu.vector_store %arg8[%c0_15, %c0_16], %19 {strides = array<i32>} : memref<8x1xf32, #tpu.memory_space<vmem>>, vector<8x1xf32>,
    return
  }
  func.func @transform_0(%arg0: i32) -> (i32, i32) {
    %c0_i32 = arith.constant 0 : i32
    %c0_i32_0 = arith.constant 0 : i32
    return %arg0, %c0_i32 : i32, i32
  }
  func.func @transform_1(%arg0: i32) -> (i32, i32) {
    %c0_i32 = arith.constant 0 : i32
    %c0_i32_0 = arith.constant 0 : i32
    return %arg0, %c0_i32 : i32, i32
  }
  func.func @transform_2(%arg0: i32) -> (i32, i32) {
    %c0_i32 = arith.constant 0 : i32
    %c0_i32_0 = arith.constant 0 : i32
    %c0_i32_1 = arith.constant 0 : i32
    return %c0_i32, %c0_i32_0 : i32, i32
  }
  func.func @transform_3(%arg0: i32) -> (i32, i32) {
    %c0_i32 = arith.constant 0 : i32
    %c0_i32_0 = arith.constant 0 : i32
    %c0_i32_1 = arith.constant 0 : i32
    return %c0_i32, %c0_i32_0 : i32, i32
  }
  func.func @transform_4(%arg0: i32) -> (i32, i32) {
    %c0_i32 = arith.constant 0 : i32
    %c0_i32_0 = arith.constant 0 : i32
    %c0_i32_1 = arith.constant 0 : i32
    return %c0_i32, %c0_i32_0 : i32, i32
  }
  func.func @transform_5(%arg0: i32) -> (i32, i32) {
    %c0_i32 = arith.constant 0 : i32
    %c0_i32_0 = arith.constant 0 : i32
    %c0_i32_1 = arith.constant 0 : i32
    return %c0_i32, %c0_i32_0 : i32, i32
  }
  func.func @transform_6(%arg0: i32) -> i32 {
    %c0_i32 = arith.constant 0 : i32
    %c0_i32_0 = arith.constant 0 : i32
    return %c0_i32 : i32
  }
  func.func @transform_7(%arg0: i32) -> (i32, i32) {
    %c0_i32 = arith.constant 0 : i32
    %c0_i32_0 = arith.constant 0 : i32
    return %arg0, %c0_i32 : i32, i32
  }
}

</mosaic_0001>

<bundles_post_ra>
// kernel: tpu_custom_call.1
= control target key start
LH: loop header
LB: loop body
LE: loop exit
PB: predicated region body
PF: predicated region fallthrough
CT: control target
= control target key end

     0   :  { %vm36_vm0 = vcmask 1043456   ;;  %vm32_vm1 = vcmask 31744   ;;  %v351_v0 = vmov 0.0   ;;  %vm352_vm2 = vmmov 0   ;;  %s441_s3 = inlined_call_operand.vmem [shape: f32[4,64], index: 3, kind: input, shape index: {}]   ;;  %s442_s1 = inlined_call_operand.vmem [shape: f32[8,4], index: 1, kind: input, shape index: {}]   ;;  %s443_s2 = inlined_call_operand.vmem [shape: f32[16,64], index: 2, kind: input, shape index: {}]   ;;  %s444_s0 = inlined_call_operand.vmem [shape: f32[8,16], index: 0, kind: input, shape index: {}]   ;;  %s445_s5 = inlined_call_operand.vmem [shape: f32[64,1], index: 5, kind: input, shape index: {}]   ;;  %s446_s4 = inlined_call_operand.vmem [shape: f32[1,64], index: 4, kind: input, shape index: {}]   ;;  %s447_s6 = inlined_call_operand.<no memory space> [shape: f32[1], index: 6, kind: input, shape index: {}]   ;;  %s448_s7 = inlined_call_operand.vmem [shape: f32[8,1], index: 7, kind: output, shape index: {}]  }
   0x1   :  { %314 = vmatprep.subr.mxu1 %v351_v0  ;;  %v31_v1 = vld [vmem:[%s441_s3] sm:$0xf]  ;;  %316 = vmatprep.mubr.msk.f32.mxu1 %vm352_vm2, %v351_v0  ;;  %v29_v3 = vld [vmem:[%s443_s2 + $0x8] sm:$0xff]  ;;  %vm110_vm3 = vcmask 130048   ;;  %v212_v6 = vld [vmem:[%s445_s5 + $0x38] sm:$0xff]  ;;  %vm215_vm5 = vcmask 523264   ;;  %v214_v32 = vstv %s447_s6 }
   0x2   :  { %v30_v2 = vld [vmem:[%s442_s1] sm:$0xff]  ;;  %315 = vmatpush3.msk.msra.mxu1 %vm36_vm0, %v31_v1  ;;  %326 = vmatprep.subr.mxu0 %v351_v0  ;;  %v211_v7 = vld [vmem:[%s445_s5 + $0x30] sm:$0xff]  ;;  %v210_v8 = vld [vmem:[%s445_s5 + $0x28] sm:$0xff]  ;;  %vm289_vm7 = vcmask 7168  }
   0x3   :  { %317 = vmatmul.mubr.msk.f32.vlgmr.msra.gmra.mxu1 %vm32_vm1, %v30_v2  ;;  %319 = vmatprep.subr.mxu1 %v351_v0  ;;  %v28_v4 = vld [vmem:[%s443_s2] sm:$0xff]  ;;  %v208_v10 = vld [vmem:[%s445_s5 + $0x18] sm:$0xff]  ;;  %v207_v11 = vld [vmem:[%s445_s5 + $0x10] sm:$0xff] }
   0x4   :  { %320 = vmatpush3.msra.mxu1 %v29_v3  ;;  %323 = vmatprep.mubr.msk.f32.mxu1 %vm352_vm2, %v351_v0  ;;  %v27_v5 = vld [vmem:[%s444_s0] sm:$0xff]  ;;  %v206_v12 = vld [vmem:[%s445_s5 + $0x8] sm:$0xff] }
   0x5   :  { %321 = vmatprep.subr.mxu1 %v351_v0  ;;  %342 = vmatprep.mubr.msk.f32.mxu0 %vm352_vm2, %v351_v0  ;;  %v209_v9 = vld [vmem:[%s445_s5 + $0x20] sm:$0xff] }
   0x6   :  { %322 = vmatpush3.msra.mxu1 %v28_v4  ;;  %327 = vmatpush3.msra.mxu0 %v212_v6  ;;  %v205_v13 = vld [vmem:[%s445_s5] sm:$0xff] }
   0x7   :  { %324 = vmatmul.mubr.msk.f32.vlgmr.msra.gmra.mxu1 %vm110_vm3, %v27_v5  ;;  %328 = vmatprep.subr.mxu0 %v351_v0  ;;  %v298_v17 = vld [vmem:[%s446_s4] ss:$0 sm:$0xff] }
   0x8   :  { %329 = vmatpush3.msra.mxu0 %v211_v7 }
   0x9   :  { %330 = vmatprep.subr.mxu0 %v351_v0 }
   0xa   :  { %331 = vmatpush3.msra.mxu0 %v210_v8 }
   0xb   :  { %332 = vmatprep.subr.mxu0 %v351_v0 }
   0xc   :  { %333 = vmatpush3.msra.mxu0 %v209_v9 }
   0xd   :  { %334 = vmatprep.subr.mxu0 %v351_v0 }
   0xe   :  { %335 = vmatpush3.msra.mxu0 %v208_v10 }
   0xf   :  { %336 = vmatprep.subr.mxu0 %v351_v0 }
  0x10   :  { %337 = vmatpush3.msra.mxu0 %v207_v11 }
  0x11   :  { %338 = vmatprep.subr.mxu0 %v351_v0 }
  0x12   :  { %339 = vmatpush3.msra.mxu0 %v206_v12 }
  0x13   :  { %340 = vmatprep.subr.mxu0 %v351_v0 }
  0x14   :  { %341 = vmatpush3.msra.mxu0 %v205_v13 }
  0xc3   :  { %v106_v14 = vpop.f32.mrf.mxu1 }
  0xc5   :  { %v318_v15 = vpop.f32.mrf.mxu1 }
  0xc7   :  { %v180_v16 = vpop.f32.mrf.mxu1 }
  0xc8   :  { %v181_v18 = vadd.f32 %v180_v16, %v106_v14 }
  0xc9   :  { %v325_v19 = vpop.f32.mrf.mxu1 }
  0xca   :  { %v191_v20 = vadd.f32 %v298_v17, %v181_v18 }
  0xcc   :  { %v193_v21 = vmul.f32 1.442695, %v191_v20  ;;  %vm192_vm6 = vcmp.gt.f32.partialorder %v191_v20, 20.0 }
  0xce   :  { %347 = vpow2.f32 %v193_v21 }
  0xdb   :  { %v348_v22 = vpop.eup %347 }
  0xdc   :  { %v195_v23 = vadd.f32 1.0, %v348_v22  ;;  %v198_v24 = vmul.f32 -0.5, %v348_v22  ;;  %v201_v26 = vand.u32 2147483647, %v348_v22 }
  0xde   :  { %349 = vlog2.f32 %v195_v23  ;;  %v199_v25 = vadd.f32 1.0, %v198_v24  ;;  %vm202_vm4 = vcmp.lt.f32.partialorder %v201_v26, 0.0004427343 }
  0xe0   :  { %v200_v29 = vmul.f32 %v348_v22, %v199_v25 }
  0xeb   :  { %v350_v27 = vpop.eup %349 }
  0xec   :  { %v197_v28 = vmul.f32 0.6931472, %v350_v27 }
  0xee   :  { %v203_v30 = vsel %vm202_vm4, %v200_v29, %v197_v28 }
  0xef   :  { %v204_v31 = vsel %vm192_vm6, %v191_v20, %v203_v30 }
  0xf0   :  { %343 = vmatmul.mubr.msk.f32.vlgmr.msra.gmra.mxu0 %vm215_vm5, %v204_v31 }
 0x1b0   :  { %v285_v33 = vpop.f32.mrf.mxu0 }
 0x1b1   :  { %v286_v34 = vadd.f32 %v285_v33, %v214_v32 }
 0x1b2   :  { %v344_v35 = vpop.f32.mrf.mxu0 }
 0x1b3   :  { %290 = vst.msk [vmem:[%s448_s7] sm:$0xff] %vm289_vm7, %v286_v34 }

</bundles_post_ra>
